<compile_context>
chip_gen: v7x
topology: tpu7x:2x2x1
jax: 0.10.0
libtpu: 0.0.40
codegen_flags: <defaults>
</compile_context>

<pallas_src>
import functools

import jax
import jax.numpy as jnp
import numpy as np
from jax.experimental import pallas as pl
from jax.experimental.pallas import tpu as pltpu


def _bce_ignore_kernel(x_ref, t_ref, loss_ref, cnt_ref, *,
                       ignore_index, hw, tiles_per_chunk):
    """One grid step: a (1, C, TP) logits tile + (1, 1, TP) label tile.

    Reduces the masked BCE loss of this tile to a scalar partial and
    accumulates it (and the valid-pixel count) into the resident (1,1,1)
    output blocks for this (image, chunk).
    """
    chunk = pl.program_id(1)
    j = pl.program_id(2)

    @pl.when(j == 0)
    def _():
        loss_ref[...] = jnp.zeros_like(loss_ref)
        cnt_ref[...] = jnp.zeros_like(cnt_ref)

    x = x_ref[0].astype(jnp.float32)             # (C, TP), channels on sublanes
    labels = t_ref[0].astype(jnp.int32)          # (1, TP), widened after load
    c, tp = x.shape

    # Ragged-tail mask: lanes past HW (only possible in the last genuine tile)
    # are excluded from BOTH the loss and the count.
    lane = jax.lax.broadcasted_iota(jnp.int32, (1, tp), 1)
    pix = (chunk * tiles_per_chunk + j) * tp + lane
    valid = jnp.logical_and(labels != ignore_index, pix < hw)   # (1, TP) bool

    # one-hot contribution x[label] without an explicit cast+mul chain; ignored
    # pixels (label == ignore_index) never match any channel index -> zeros,
    # exactly matching the PyTorch one-hot-of-zeros behaviour.
    ch = jax.lax.broadcasted_iota(jnp.int32, (c, tp), 0)
    picked = jnp.where(ch == labels, x, 0.0)                    # (C, TP)

    # numerically-stable BCE-with-logits:
    #   l = max(x, 0) - x * t + log(1 + exp(-|x|))
    base = jnp.maximum(x, 0.0) + jnp.log1p(jnp.exp(-jnp.abs(x)))
    loss = jnp.where(valid, base - picked, 0.0)                 # mask once, as select

    loss_ref[...] += jnp.sum(loss, axis=(0, 1), keepdims=True).reshape(1, 1, 1)
    cnt_ref[...] += jnp.sum(valid.astype(jnp.float32), axis=(0, 1),
                            keepdims=True).reshape(1, 1, 1)


def _sublane_padded_rows(rows, itemsize):
    """Rows after TPU sublane padding for the given element size."""
    pack = max(1, 4 // itemsize)        # elements packed per 32-bit sublane word
    mult = 8 * pack
    return pl.cdiv(rows, mult) * mult


def bce_with_logits_ignore_loss(inputs, targets, weight=None,
                                reduction="mean", ignore_index=255):
    """inputs: (N, C, H, W) float logits; targets: (N, H, W) int labels."""
    if weight is not None:
        # TODO(synk): optional per-pixel `weight` multiplier not implemented.
        raise NotImplementedError("per-pixel weight is not implemented")
    if reduction not in ("mean", "sum"):
        # TODO(synk): reduction='none' (per-pixel map * targets.sum(dim=1)) not implemented.
        raise NotImplementedError("only 'mean' and 'sum' reductions are implemented")

    N, C, H, W = inputs.shape
    hw = H * W
    LANE = 128

    # ----- generation-aware tile sizing ------------------------------------
    vmem_phys = None
    try:
        info = pltpu.get_tpu_info()
        for name in ("vmem_capacity_bytes", "vmem_size_bytes", "vmem_bytes"):
            v = getattr(info, name, None)
            if v:
                vmem_phys = int(v)
                break
    except Exception:
        pass
    if vmem_phys is None:
        vmem_phys = 64 * 1024 * 1024            # conservative (v7x) fallback

    # Total budget for the double-buffered input tiles (outputs are tiny).
    if vmem_phys >= 96 * 1024 * 1024:           # v5e / v6e: 128 MiB physical
        buf_budget = 24 * 1024 * 1024
    else:                                       # v7x: 64 MiB physical
        buf_budget = 12 * 1024 * 1024

    x_item = inputs.dtype.itemsize
    t_item = targets.dtype.itemsize
    # Bytes of VMEM per pixel of tile, with sublane padding and 2x buffering.
    per_pixel = (2 * _sublane_padded_rows(C, x_item) * x_item +
                 2 * _sublane_padded_rows(1, t_item) * t_item)

    hw_lanes = pl.cdiv(hw, LANE) * LANE
    tp = (buf_budget // per_pixel) // LANE * LANE
    tp = max(LANE, min(tp, hw_lanes))

    n_tiles = pl.cdiv(hw, tp)
    # Split pixel tiles into 2 parallel chunks (megacore balance for small/odd N)
    # only when it divides evenly, so every block index stays in range.
    n_chunks = 2 if (n_tiles >= 2 and n_tiles % 2 == 0) else 1
    tiles_per_chunk = n_tiles // n_chunks

    vmem_limit = int(min(vmem_phys // 2, buf_budget + (8 << 20)))

    # ----- channel-major views straight from NCHW (no transpose, no pad) ----
    x = inputs.reshape(N, C, hw)                       # native dtype (bf16 OK)
    t = targets.reshape(N, 1, hw)                      # native label dtype

    grid = (N, n_chunks, tiles_per_chunk)
    kernel = functools.partial(_bce_ignore_kernel, ignore_index=ignore_index,
                               hw=hw, tiles_per_chunk=tiles_per_chunk)

    n_px = N * hw
    cost = pl.CostEstimate(
        flops=10 * n_px * C,
        transcendentals=2 * n_px * C,
        bytes_accessed=n_px * C * x_item + n_px * t_item + N * n_chunks * 2 * 4,
    )

    loss_part, cnt_part = pl.pallas_call(
        kernel,
        out_shape=(
            jax.ShapeDtypeStruct((N * n_chunks, 1, 1), jnp.float32),
            jax.ShapeDtypeStruct((N * n_chunks, 1, 1), jnp.float32),
        ),
        grid_spec=pltpu.PrefetchScalarGridSpec(
            num_scalar_prefetch=0,
            grid=grid,
            in_specs=[
                pl.BlockSpec((1, C, tp),
                             lambda n, c, j: (n, 0, c * tiles_per_chunk + j)),
                pl.BlockSpec((1, 1, tp),
                             lambda n, c, j: (n, 0, c * tiles_per_chunk + j)),
            ],
            out_specs=[
                pl.BlockSpec((1, 1, 1), lambda n, c, j: (n * n_chunks + c, 0, 0)),
                pl.BlockSpec((1, 1, 1), lambda n, c, j: (n * n_chunks + c, 0, 0)),
            ],
        ),
        compiler_params=pltpu.CompilerParams(
            dimension_semantics=("parallel", "parallel", "arbitrary"),
            vmem_limit_bytes=vmem_limit),
        cost_estimate=cost,
    )(x, t)

    loss_sum = jnp.sum(loss_part)
    count = jnp.sum(cnt_part)

    if reduction == "mean":
        # count == 0 -> NaN, matching torch.masked_select(...).mean() on empty.
        return loss_sum / count
    else:  # "sum"
        return loss_sum


def _reference_loss(inputs, targets, ignore_index=255):
    """Pure-JAX reference mirroring the PyTorch forward (reduction='mean')."""
    N, C, H, W = inputs.shape
    valid = targets != ignore_index                                # (N, H, W)
    labels = jnp.where(valid, targets, 0)
    onehot = jax.nn.one_hot(labels, C, axis=1, dtype=jnp.float32)  # (N, C, H, W)
    onehot = onehot * valid[:, None, :, :].astype(jnp.float32)
    x = inputs.astype(jnp.float32)
    loss = jnp.maximum(x, 0.0) - x * onehot + jnp.log1p(jnp.exp(-jnp.abs(x)))
    per_pixel = loss.sum(axis=1)                                   # (N, H, W)
    return jnp.sum(jnp.where(valid, per_pixel, 0.0)) / jnp.sum(valid)


if __name__ == "__main__":
    key = jax.random.PRNGKey(0)
    k1, k2, k3 = jax.random.split(key, 3)

    N, C, H, W = 2, 4, 16, 16
    inputs = jax.random.normal(k1, (N, C, H, W), dtype=jnp.float32)
    targets = jax.random.randint(k2, (N, H, W), 0, C, dtype=jnp.int32)
    ignore_mask = jax.random.bernoulli(k3, 0.2, (N, H, W))
    targets = jnp.where(ignore_mask, 255, targets)

    out = bce_with_logits_ignore_loss(inputs, targets, reduction="mean",
                                      ignore_index=255)
    out = jax.block_until_ready(out)

    ref = jax.block_until_ready(_reference_loss(inputs, targets, ignore_index=255))
    assert np.allclose(np.asarray(out), np.asarray(ref), rtol=1e-5, atol=1e-5), (out, ref)

    print("KERNEL_OK")
</pallas_src>

<mosaic_0001>
module attributes {stable_mosaic.version = 11 : i64} {
  func.func @_bce_ignore_kernel(%arg0: i32, %arg1: i32, %arg2: i32, %arg3: memref<1x4x256xf32, #tpu.memory_space<vmem>>, %arg4: memref<1x1x256xi32, #tpu.memory_space<vmem>>, %arg5: memref<1x1x1xf32, #tpu.memory_space<vmem>>, %arg6: memref<1x1x1xf32, #tpu.memory_space<vmem>>) attributes {dimension_semantics = [#tpu.dimension_semantics<parallel>, #tpu.dimension_semantics<parallel>, #tpu.dimension_semantics<arbitrary>], iteration_bounds = array<i64: 2, 1, 1>, scalar_prefetch = 0 : i64, scratch_operands = 0 : i64, tpu.core_type = #tpu.core_type<tc>, window_params = [{transform_indices = @transform_0, window_bounds = array<i64: 1, 4, 256>}, {transform_indices = @transform_1, window_bounds = array<i64: 1, 1, 256>}, {transform_indices = @transform_2, window_bounds = array<i64: 1, 1, 1>}, {transform_indices = @transform_3, window_bounds = array<i64: 1, 1, 1>}]} {
    %c0_i32 = arith.constant 0 : i32
    %0 = arith.cmpi eq, %arg2, %c0_i32 : i32
    %1 = arith.extui %0 : i1 to i32
    %c0_i32_0 = arith.constant 0 : i32
    %2 = arith.cmpi ne, %1, %c0_i32_0 : i32
    scf.if %2 {
      %cst_24 = arith.constant 0.000000e+00 : f32
      %56 = vector.broadcast %cst_24 : f32 to vector<1x1x1xf32>
      %c0_25 = arith.constant 0 : index
      %c0_26 = arith.constant 0 : index
      %c0_27 = arith.constant 0 : index
      %57 = vector.load %arg5[%c0_25, %c0_26, %c0_27] : memref<1x1x1xf32, #tpu.memory_space<vmem>>, vector<1x1x1xf32>
      tpu.vector_store %arg5[%c0_25, %c0_26, %c0_27], %56 {strides = array<i32>} : memref<1x1x1xf32, #tpu.memory_space<vmem>>, vector<1x1x1xf32>,
      %cst_28 = arith.constant 0.000000e+00 : f32
      %58 = vector.broadcast %cst_28 : f32 to vector<1x1x1xf32>
      %c0_29 = arith.constant 0 : index
      %c0_30 = arith.constant 0 : index
      %c0_31 = arith.constant 0 : index
      %59 = vector.load %arg6[%c0_29, %c0_30, %c0_31] : memref<1x1x1xf32, #tpu.memory_space<vmem>>, vector<1x1x1xf32>
      tpu.vector_store %arg6[%c0_29, %c0_30, %c0_31], %58 {strides = array<i32>} : memref<1x1x1xf32, #tpu.memory_space<vmem>>, vector<1x1x1xf32>,
    } else {
    }
    %c0 = arith.constant 0 : index
    %c0_1 = arith.constant 0 : index
    %c0_2 = arith.constant 0 : index
    %3 = vector.load %arg3[%c0, %c0_1, %c0_2] : memref<1x4x256xf32, #tpu.memory_space<vmem>>, vector<1x4x256xf32>
    %4 = vector.shape_cast %3 : vector<1x4x256xf32> to vector<4x256xf32>
    %c0_3 = arith.constant 0 : index
    %c0_4 = arith.constant 0 : index
    %c0_5 = arith.constant 0 : index
    %5 = vector.load %arg4[%c0_3, %c0_4, %c0_5] : memref<1x1x256xi32, #tpu.memory_space<vmem>>, vector<1x1x256xi32>
    %6 = vector.shape_cast %5 : vector<1x1x256xi32> to vector<1x256xi32>
    %7 = tpu.iota {dimensions = array<i32: 1>} : vector<1x256xi32>
    %c1_i32 = arith.constant 1 : i32
    %8 = arith.muli %arg1, %c1_i32 : i32
    %9 = arith.addi %8, %arg2 : i32
    %c256_i32 = arith.constant 256 : i32
    %10 = arith.muli %9, %c256_i32 : i32
    %11 = vector.broadcast %10 : i32 to vector<1x256xi32>
    %12 = arith.addi %11, %7 : vector<1x256xi32>
    %c255_i32 = arith.constant 255 : i32
    %13 = vector.broadcast %c255_i32 : i32 to vector<1x256xi32>
    %14 = arith.cmpi ne, %6, %13 : vector<1x256xi32>
    %c256_i32_6 = arith.constant 256 : i32
    %15 = vector.broadcast %c256_i32_6 : i32 to vector<1x256xi32>
    %16 = arith.cmpi slt, %12, %15 : vector<1x256xi32>
    %17 = arith.andi %14, %16 : vector<1x256xi1>
    %18 = tpu.iota {dimensions = array<i32: 0>} : vector<4x256xi32>
    %19 = vector.broadcast %6 : vector<1x256xi32> to vector<4x256xi32>
    %20 = arith.cmpi eq, %18, %19 : vector<4x256xi32>
    %cst = arith.constant 0.000000e+00 : f32
    %21 = vector.broadcast %cst : f32 to vector<4x256xf32>
    %22 = arith.select %20, %4, %21 : vector<4x256xi1>, vector<4x256xf32>
    %cst_7 = arith.constant 0.000000e+00 : f32
    %23 = vector.broadcast %cst_7 : f32 to vector<4x256xf32>
    %24 = arith.maximumf %4, %23 : vector<4x256xf32>
    %25 = math.absf %4 : vector<4x256xf32>
    %cst_8 = arith.constant 0.000000e+00 : f32
    %26 = vector.broadcast %cst_8 : f32 to vector<4x256xf32>
    %27 = arith.subf %26, %25 : vector<4x256xf32>
    %28 = math.exp %27 : vector<4x256xf32>
    %29 = math.log1p %28 : vector<4x256xf32>
    %30 = arith.addf %24, %29 : vector<4x256xf32>
    %31 = arith.subf %30, %22 : vector<4x256xf32>
    %cst_9 = arith.constant 0.000000e+00 : f32
    %32 = vector.shape_cast %17 : vector<1x256xi1> to vector<1x256xi1>
    %33 = vector.broadcast %32 : vector<1x256xi1> to vector<4x256xi1>
    %34 = vector.broadcast %cst_9 : f32 to vector<4x256xf32>
    %35 = arith.select %33, %31, %34 : vector<4x256xi1>, vector<4x256xf32>
    %c0_10 = arith.constant 0 : index
    %c0_11 = arith.constant 0 : index
    %c0_12 = arith.constant 0 : index
    %36 = vector.load %arg5[%c0_10, %c0_11, %c0_12] : memref<1x1x1xf32, #tpu.memory_space<vmem>>, vector<1x1x1xf32>
    %37 = vector.shape_cast %35 : vector<4x256xf32> to vector<1x4x256xf32>
    %cst_13 = arith.constant dense<0.000000e+00> : vector<1xf32>
    %38 = vector.multi_reduction <add>, %37, %cst_13 [1, 2] : vector<1x4x256xf32> to vector<1xf32>
    %39 = vector.shape_cast %38 : vector<1xf32> to vector<1x1x1xf32>
    %40 = vector.extract %39[0, 0, 0] : f32 from vector<1x1x1xf32>
    %41 = vector.broadcast %40 : f32 to vector<1x1xf32>
    %42 = vector.shape_cast %41 : vector<1x1xf32> to vector<1x1x1xf32>
    %43 = arith.addf %36, %42 : vector<1x1x1xf32>
    %c0_14 = arith.constant 0 : index
    %c0_15 = arith.constant 0 : index
    %c0_16 = arith.constant 0 : index
    %44 = vector.load %arg5[%c0_14, %c0_15, %c0_16] : memref<1x1x1xf32, #tpu.memory_space<vmem>>, vector<1x1x1xf32>
    tpu.vector_store %arg5[%c0_14, %c0_15, %c0_16], %43 {strides = array<i32>} : memref<1x1x1xf32, #tpu.memory_space<vmem>>, vector<1x1x1xf32>,
    %c0_17 = arith.constant 0 : index
    %c0_18 = arith.constant 0 : index
    %c0_19 = arith.constant 0 : index
    %45 = vector.load %arg6[%c0_17, %c0_18, %c0_19] : memref<1x1x1xf32, #tpu.memory_space<vmem>>, vector<1x1x1xf32>
    %46 = arith.extui %17 : vector<1x256xi1> to vector<1x256xi32>
    %47 = arith.sitofp %46 : vector<1x256xi32> to vector<1x256xf32>
    %48 = vector.shape_cast %47 : vector<1x256xf32> to vector<1x1x256xf32>
    %cst_20 = arith.constant dense<0.000000e+00> : vector<1xf32>
    %49 = vector.multi_reduction <add>, %48, %cst_20 [1, 2] : vector<1x1x256xf32> to vector<1xf32>
    %50 = vector.shape_cast %49 : vector<1xf32> to vector<1x1x1xf32>
    %51 = vector.extract %50[0, 0, 0] : f32 from vector<1x1x1xf32>
    %52 = vector.broadcast %51 : f32 to vector<1x1xf32>
    %53 = vector.shape_cast %52 : vector<1x1xf32> to vector<1x1x1xf32>
    %54 = arith.addf %45, %53 : vector<1x1x1xf32>
    %c0_21 = arith.constant 0 : index
    %c0_22 = arith.constant 0 : index
    %c0_23 = arith.constant 0 : index
    %55 = vector.load %arg6[%c0_21, %c0_22, %c0_23] : memref<1x1x1xf32, #tpu.memory_space<vmem>>, vector<1x1x1xf32>
    tpu.vector_store %arg6[%c0_21, %c0_22, %c0_23], %54 {strides = array<i32>} : memref<1x1x1xf32, #tpu.memory_space<vmem>>, vector<1x1x1xf32>,
    return
  }
  func.func @transform_0(%arg0: i32, %arg1: i32, %arg2: i32) -> (i32, i32, i32) {
    %c1_i32 = arith.constant 1 : i32
    %0 = arith.muli %arg1, %c1_i32 : i32
    %1 = arith.addi %0, %arg2 : i32
    %c0_i32 = arith.constant 0 : i32
    %c0_i32_0 = arith.constant 0 : i32
    return %arg0, %c0_i32, %1 : i32, i32, i32
  }
  func.func @transform_1(%arg0: i32, %arg1: i32, %arg2: i32) -> (i32, i32, i32) {
    %c1_i32 = arith.constant 1 : i32
    %0 = arith.muli %arg1, %c1_i32 : i32
    %1 = arith.addi %0, %arg2 : i32
    %c0_i32 = arith.constant 0 : i32
    %c0_i32_0 = arith.constant 0 : i32
    return %arg0, %c0_i32, %1 : i32, i32, i32
  }
  func.func @transform_2(%arg0: i32, %arg1: i32, %arg2: i32) -> (i32, i32, i32) {
    %c1_i32 = arith.constant 1 : i32
    %0 = arith.muli %arg0, %c1_i32 : i32
    %1 = arith.addi %0, %arg1 : i32
    %c0_i32 = arith.constant 0 : i32
    %c0_i32_0 = arith.constant 0 : i32
    %c0_i32_1 = arith.constant 0 : i32
    return %1, %c0_i32, %c0_i32_0 : i32, i32, i32
  }
  func.func @transform_3(%arg0: i32, %arg1: i32, %arg2: i32) -> (i32, i32, i32) {
    %c1_i32 = arith.constant 1 : i32
    %0 = arith.muli %arg0, %c1_i32 : i32
    %1 = arith.addi %0, %arg1 : i32
    %c0_i32 = arith.constant 0 : i32
    %c0_i32_0 = arith.constant 0 : i32
    %c0_i32_1 = arith.constant 0 : i32
    return %1, %c0_i32, %c0_i32_0 : i32, i32, i32
  }
}

</mosaic_0001>

<bundles_post_ra>
// kernel: tpu_custom_call.1
= control target key start
LH: loop header
LB: loop body
LE: loop exit
PB: predicated region body
PF: predicated region fallthrough
CT: control target
= control target key end

     0   :  { %9 = vsyncpa [#allocation3], 0  ;;  %s964_s0 = inlined_call_operand.hbm [shape: f32[2,4,256], index: 0, kind: input, shape index: {}]   ;;  %s965_s1 = inlined_call_operand.hbm [shape: s32[2,1,256], index: 1, kind: input, shape index: {}]   ;;  %s966_s2 = inlined_call_operand.vmem [shape: f32[2,1,1], index: 2, kind: output, shape index: {0}]   ;;  %s967_s3 = inlined_call_operand.vmem [shape: f32[2,1,1], index: 3, kind: output, shape index: {1}]  }
   0x1   :  { %11 = vsyncpa [#allocation3 + $0x1], 0 }
   0x2   :  { %12 = vsyncpa [#allocation5], 0 }
   0x3   :  { %14 = vsyncpa [#allocation5 + $0x1], 0  ;;  %s783_s12 = smov 0   ;;  %s785_s13 = smov 0  }
   0x4   :  { %s787_s14 = smov 0   ;;  %s789_s15 = smov 0  }
   0x5   :  { %s791_s16 = smov 0   ;;  %s793_s17 = smov 0  }
   0x6 LB: > { %s550_s18 = sadd.s32 4294967295, %s755_s17   ;;  %s39_s19 = sadd.s32 1, %s751_s16  ;;  %s755_s17 = sphi %s793_s17, %s20_s17   ;;  %s751_s16 = sphi %s791_s16, %s983_s16   ;;  %s747_s15 = sphi %s789_s15, %s982_s15   ;;  %s743_s14 = sphi %s787_s14, %s981_s14   ;;  %s739_s13 = sphi %s785_s13, %s980_s13   ;;  %s735_s12 = sphi %s783_s12, %s979_s12  }
   0x7   : > { %p41_p0 = scmp.ge.s32.totalorder %s39_s19, 2  ;;  %s50_s20 = sadd.s32 1, %s743_s14 }
   0x8   : > { %p57_p1 = scmp.ne.s32.totalorder %s743_s14, %s739_s13  ;;  %p58_p2 = scmp.eq.s32.totalorder %s755_s17, 0 }
   0x9   : > { %s985_s19 = smov (%p41_p0, %s39_s19), 0  ;;  %p63_p4 = scmp.ne.s32.totalorder %s739_s13, %s735_s12 }
   0xa   : > { %p819_p3 = por %p58_p2, %p57_p1  ;;  %s45_s22 = ssub.s32 %s751_s16, %s985_s19 }
   0xb   : > { %p64_p5 = scmp.eq.s32.totalorder %s550_s18, 0  ;;  %p48_p6 = scmp.eq.s32.totalorder %s45_s22, 0 }
   0xc   : > { %p583_p8 = scmp.lt.s32.totalorder %s755_s17, 2  ;;  %s835_s25 = sand.u32 1, %s743_s14  }
   0xd   : > { %p826_p7 = por %p64_p5, %p63_p4  ;;  %s566_s26 = sshll.u32 %s751_s16, 7 }
   0xe   : > { %s832_s24 = scalar_select %p48_p6, %s743_s14, %s50_s20  }
   0xf   : > { %s970_s23 = scalar_select %p826_p7, 1, 0 }
  0x10   : > { %s554_s27 = sshll.u32 %s835_s25, 3  ;;  %s842_s30 = scalar_lea.hbm %s964_s0, %s566_s26 }
  0x11   : > { %s177_s4 = scalar_lea.vmem [#allocation2], %s554_s27  ;;  %p846_p9 = pnand %p583_p8, %p819_p3 }
  0x12   : > { %s188_s5 = sshll.u32 %s177_s4, 4  ;;  %s174_s7 = scalar_lea.sflag [#allocation3], %s835_s25  ;;  %s850_s5 = int_to_ptr.vmem [resolvable:$true] %s188_s5 }
  0x13   : > { %s641_s8 = scalar_lea.hbm %s842_s30, 128  ;;  %p643_p13 = pneg %p846_p9 }
  0x14   : > { %p642_p12 = scmp.ne.s32.totalorder %s842_s30, %s641_s8  ;;  %s646_s11 = scalar_lea.hbm %s964_s0, 256 }
  0x15   : > { %p647_p2 = scmp.lt.u32.totalorder %s842_s30, %s964_s0  ;;  %p648_p3 = scmp.lt.u32.totalorder %s646_s11, %s641_s8 }
  0x16   : > { %p644_p0 = pnand %p643_p13, %p642_p12  ;;  %p650_p5 = scmp.lt.u32.totalorder %s641_s8, %s842_s30 }
  0x17   : > { %p649_p4 = por %p648_p3, %p647_p2 }
  0x18   : > { %p645_p1 = pneg %p644_p0 }
  0x19   : > { %p651_p6 = por %p650_p5, %p649_p4 }
  0x1b   : > { %p652_p8 = pnand %p651_p6, %p645_p1 }
  0x1d   : > { %655 = shalt.err (!%p652_p8)
}
  0x1e   : > { %s656_s20 = scalar_lea.vmem %s850_s5, 128  ;;  %s757_s21 = smov [#allocation2]  }
  0x1f   : > { %p657_p12 = scmp.ne.s32.totalorder %s850_s5, %s656_s20  ;;  %s661_s22 = sshll.u32 %s757_s21, 4  ;;  %s662_s22 = int_to_ptr.vmem [resolvable:$false] %s661_s22 }
  0x20   : > { %s663_s26 = scalar_lea.vmem %s662_s22, 256  ;;  %p664_p11 = scmp.lt.s32.totalorder %s850_s5, %s662_s22 }
  0x21   : > { %p659_p0 = pnand %p657_p12, %p643_p13  ;;  %p665_p2 = scmp.lt.s32.totalorder %s663_s26, %s656_s20 }
  0x23   : > { %p660_p10 = pneg %p659_p0  ;;  %p666_p3 = por %p665_p2, %p664_p11 }
  0x25   : > { %p667_p4 = pnand %p666_p3, %p660_p10 }
  0x27   : > { %670 = shalt.err (!%p667_p4)
}
  0x28   : > { %579 = dma.hbm_to_vmem [thread:$0]  (!%p846_p9), %s842_s30, 128, %s850_s5, %s174_s7  }
  0x29   : > { %p972_p1 = scmp.lt.s32.totalorder %s755_s17, 3  ;;  %p973_p5 = scmp.ge.s32.totalorder %s755_s17, 1 }
  0x2a   : > { %s557_s28 = sshll.u32 %s835_s25, 1  ;;  %s567_s29 = sshll.u32 %s751_s16, 5 }
  0x2b   : > { %p884_p6 = pnand %p973_p5, %p972_p1  ;;  %s893_s9 = scalar_lea.hbm %s965_s1, %s567_s29 }
  0x2c   : > { %s199_s10 = scalar_lea.vmem [#allocation4], %s557_s28  ;;  %s196_s30 = scalar_lea.sflag [#allocation5], %s835_s25 }
  0x2d   : > { %s974_s27 = scalar_select %p884_p6, 1, 0 }
  0x2e   : > { %s210_s11 = sshll.u32 %s199_s10, 4  ;;  %s671_s5 = scalar_lea.hbm %s893_s9, 32  ;;  %s211_s11 = int_to_ptr.vmem [resolvable:$true] %s210_s11 }
  0x2f   : > { %p672_p10 = scmp.ne.s32.totalorder %s893_s9, %s671_s5  ;;  %s676_s18 = scalar_lea.hbm %s965_s1, 64 }
  0x30   : > { %p677_p12 = scmp.lt.u32.totalorder %s893_s9, %s965_s1  ;;  %p678_p0 = scmp.lt.u32.totalorder %s676_s18, %s671_s5 }
  0x31   : > { %p674_p11 = pnand %p672_p10, %p643_p13  ;;  %p680_p3 = scmp.lt.u32.totalorder %s671_s5, %s893_s9 }
  0x32   : > { %p679_p2 = por %p678_p0, %p677_p12 }
  0x33   : > { %p675_p8 = pneg %p674_p11 }
  0x34   : > { %p681_p4 = por %p680_p3, %p679_p2 }
  0x36   : > { %p682_p1 = pnand %p681_p4, %p675_p8 }
  0x38   : > { %685 = shalt.err (!%p682_p1)
}
  0x39   : > { %s686_s25 = scalar_lea.vmem %s211_s11, 32  ;;  %s758_s22 = smov [#allocation4]  }
  0x3a   : > { %p687_p5 = scmp.ne.s32.totalorder %s211_s11, %s686_s25  ;;  %s691_s26 = sshll.u32 %s758_s22, 4  ;;  %s692_s26 = int_to_ptr.vmem [resolvable:$false] %s691_s26 }
  0x3b   : > { %s693_s28 = scalar_lea.vmem %s692_s26, 64  ;;  %p694_p7 = scmp.lt.s32.totalorder %s211_s11, %s692_s26 }
  0x3c   : > { %p689_p10 = pnand %p687_p5, %p643_p13  ;;  %p695_p6 = scmp.lt.s32.totalorder %s693_s28, %s686_s25 }
  0x3e   : > { %p690_p11 = pneg %p689_p10  ;;  %p696_p0 = por %p695_p6, %p694_p7 }
  0x40   : > { %p697_p12 = pnand %p696_p0, %p690_p11 }
  0x42   : > { %700 = shalt.err (!%p697_p12)
}
  0x43   : > { %582 = dma.hbm_to_vmem [thread:$0]  (!%p846_p9), %s893_s9, 32, %s211_s11, %s196_s30  }
  0x44   : > { %p975_p8 = scmp.ne.s32.totalorder %s974_s27, 0 }
  0x45   : > { %s221_s29 = sand.u32 (!%p975_p8), 1, %s739_s13   ;;  %p976_p13 = scmp.ne.s32.totalorder (!%p975_p8), %s970_s23, 0 }
  0x46   : > { %219 = sbr.rel (%p975_p8) target bundleno = 337 (0x151), region = 28  ;;  %s561_s4 = sshll.u32 (!%p975_p8), %s221_s29, 3 }
  0x47   : > { %s222_s8 = scalar_lea.sflag (!%p975_p8), [#allocation3], %s221_s29  ;;  %s225_s10 = scalar_lea.vmem (!%p975_p8), [#allocation2], %s561_s4 }
  0x4d   : > { %726 = dma.done.wait (%p976_p13), %s222_s8, 128  }
  0x4e   : > { %728 = vsyncadd (%p976_p13), %s222_s8, 4294967168  ;;  %s562_s5 = sshll.u32 %s221_s29, 1  ;;  %s231_s7 = scalar_lea.sflag [#allocation5], %s221_s29 }
  0x4f   : > { %s234_s6 = scalar_lea.vmem [#allocation4], %s562_s5 }
  0x50   : > { %730 = dma.done.wait (%p976_p13), %s231_s7, 32  }
  0x51   : > { %732 = vsyncadd (%p976_p13), %s231_s7, 4294967264  ;;  %v286_v0 = vld [vmem:[%s225_s10] sm:$0xff]  ;;  %v759_v2 = vmov 1966171168   ;;  %v305_v4 = vlaneseq  ;;  %v760_v9 = vmov 1   ;;  %v761_v26 = vmov 0  }
  0x52   : > { %v336_v1 = vand.u32 2147483647, %v286_v0  ;;  %v303_v3 = vunpack.c.l.s4 %v759_v2  ;;  %v301_v10 = vcombine.low %v760_v9, %v760_v9  ;;  %v287_v18 = vld [vmem:[%s234_s6] sm:$0x3]  ;;  %v331_v23 = vcombine.high %v286_v0, %v286_v0  ;;  %p270_p7 = scmp.lt.s32.totalorder %s747_s15, 1 }
  0x53   : > { %v306_v8 = vshrl.u32 %v305_v4, 7  ;;  %vm296_vm0 = vcmp.ne.s32.totalorder %v287_v18, 255  ;;  %v335_v32 = vmax.f32 %v286_v0, 0.0  ;;  %v762_v39 = vmov 0.0  }
  0x54   : > { %v337_v5 = vsub.f32 0.0, %v336_v1  ;;  %v304_v7 = vunpack.c.0.s8 %v303_v3  ;;  %vm372_vm7 = vcmask 1043456   ;;  %vm402_vm9 = vcmask 1040384   ;;  %s987_s15 = smov (!%p270_p7, %s747_s15), 1 }
  0x55   : > { %v322_v15 = vsub.s32 0, %v306_v8  ;;  %v326_v16 = vsub.s32 1, %v306_v8  ;;  %vm283_vm10 = vcmask 0   ;;  %s272_s9 = scalar_lea.vmem %s966_s2, %s987_s15  ;;  %s277_s12 = scalar_lea.vmem %s967_s3, %s987_s15 }
  0x56   : > { %v338_v6 = vmul.f32 1.442695, %v337_v5  ;;  %v307_v11 = vsub.s32 %v304_v7, %v306_v8  ;;  %284 = vst.msk [vmem:[%s272_s9] sm:$0x1] %vm283_vm10, %v762_v39  ;;  %285 = vst.msk [vmem:[%s277_s12] sm:$0x1] %vm283_vm10, %v762_v39 }
  0x57   : > { %v323_v20 = vrot.slane %v287_v18, %v322_v15  ;;  %v327_v21 = vrot.slane %v287_v18, %v326_v16 }
  0x58   : > { %637 = vpow2.f32 %v338_v6  ;;  %v308_v12 = vrot.slane %v301_v10, %v307_v11 }
  0x59   : > { %vm328_vm3 = vcmp.eq.s32.totalorder %v306_v8, %v323_v20  ;;  %vm329_vm4 = vcmp.eq.s32.totalorder %v306_v8, %v327_v21 }
  0x5a   : > { %v315_v14 = vrot.slane %v308_v12, %v307_v11  ;;  %v333_v28 = vsel %vm328_vm3, %v286_v0, 0.0  ;;  %v334_v29 = vsel %vm329_vm4, %v331_v23, 0.0 }
  0x5b   : > { %v352_v35 = vcombine.low %v333_v28, %v334_v29 }
  0x5c   : > { %vm316_vm1 = vcmp.ne.s32.totalorder %v315_v14, 0 }
  0x5d   : > { %vm926_vm2 = vmand %vm296_vm0, %vm316_vm1  ;;  %v371_v3 = vld [vmem:[%s272_s9] sm:$0x1] }
  0x5e   : > { %v355_v27 = vsel %vm926_vm2, 1, %v761_v26  ;;  %v563_v40 = vsel %vm926_vm2, 1.0, %v762_v39  ;;  %v389_v6 = vld [vmem:[%s277_s12] sm:$0x1] }
  0x5f   : > { %v359_v34 = vrot.slane %v355_v27, %v322_v15  ;;  %v363_v37 = vrot.slane %v355_v27, %v326_v16  ;;  %v395_v42 = vrot.slane %v563_v40, %v322_v15  ;;  %v399_v43 = vrot.slane %v563_v40, %v326_v16 }
  0x61   : > { %vm364_vm6 = vcmp.eq.s32.totalorder %v359_v34, 1  ;;  %vm365_vm8 = vcmp.eq.s32.totalorder %v363_v37, 1  ;;  %v403_v49 = vsel %vm402_vm9, %v395_v42, 0.0  ;;  %v404_v50 = vsel %vm402_vm9, %v399_v43, 0.0 }
  0x62   : > { %v638_v13 = vpop.eup %637  ;;  %v405_v52 = vadd.f32 %v404_v50, %v403_v49 }
  0x63   : > { %v340_v17 = vadd.f32 1.0, %v638_v13  ;;  %v343_v19 = vmul.f32 -0.5, %v638_v13  ;;  %v346_v25 = vand.u32 2147483647, %v638_v13 }
  0x65   : > { %639 = vlog2.f32 %v340_v17  ;;  %v344_v24 = vadd.f32 1.0, %v343_v19  ;;  %vm347_vm5 = vcmp.lt.f32.partialorder %v346_v25, 0.0004427343 }
  0x67   : > { %v345_v30 = vmul.f32 %v638_v13, %v344_v24 }
  0x6f   : > { %v640_v31 = vpop.eup %639 }
  0x70   : > { %v342_v33 = vmul.f32 0.6931472, %v640_v31 }
  0x72   : > { %v348_v36 = vsel %vm347_vm5, %v345_v30, %v342_v33 }
  0x73   : > { %v349_v38 = vadd.f32 %v348_v36, %v335_v32 }
  0x75   : > { %v354_v41 = vsub.f32 %v349_v38, %v352_v35 }
  0x77   : > { %v367_v44 = vcombine.high %v354_v41, %v354_v41  ;;  %v369_v45 = vsel %vm364_vm6, %v354_v41, 0.0 }
  0x78   : > { %v373_v46 = vsel %vm372_vm7, %v369_v45, 0.0 }
  0x79   : > { %v370_v47 = vsel %vm365_vm8, %v367_v44, 0.0 }
  0x7a   : > { %v374_v48 = vsel %vm372_vm7, %v370_v47, 0.0 }
  0x7b   : > { %v375_v51 = vadd.f32 %v374_v48, %v373_v46 }
  0x7d   : > { %376 = vadd.xlane.f32.xlu0 %v375_v51 }
  0x81   : > { %406 = vadd.xlane.f32.xlu0 %v405_v52 }
 0x10a   : > { %v377_v53 = vpop.xlane.xlu0 %376 }
 0x10b   : > { %v378_v54 = vrot.slane %v377_v53, 4 }
 0x10d   : > { %v379_v55 = vadd.f32 %v378_v54, %v377_v53 }
 0x10e   : > { %v407_v56 = vpop.xlane.xlu0 %406 }
 0x10f   : > { %v380_v57 = vrot.slane %v379_v55, 2  ;;  %v408_v58 = vrot.slane %v407_v56, 4 }
 0x111   : > { %v409_v59 = vadd.f32 %v408_v58, %v407_v56  ;;  %v381_v60 = vadd.f32 %v380_v57, %v379_v55 }
 0x113   : > { %v410_v61 = vrot.slane %v409_v59, 2  ;;  %v382_v62 = vrot.slane %v381_v60, 1 }
 0x115   : > { %v411_v63 = vadd.f32 %v410_v61, %v409_v59  ;;  %v383_v0 = vadd.f32 %v382_v62, %v381_v60 }
 0x117   : > { %568 = vpush %v383_v0  ;;  %v412_v1 = vrot.slane %v411_v63, 1 }
 0x119   : > { %v413_v2 = vadd.f32 %v412_v1, %v411_v63 }
 0x11b   : > { %570 = vpush %v413_v2 }
 0x148   : > { %s569_s15 = spop %568 }
 0x149   : > { %v385_v4 = vstv %s569_s15 }
 0x14a   : > { %v386_v5 = vadd.f32 %v385_v4, %v371_v3 }
 0x14c   : > { %388 = vst.msk [vmem:[%s272_s9] sm:$0x1] %vm283_vm10, %v386_v5  ;;  %s571_s18 = spop %570 }
 0x14d   : > { %v415_v7 = vstv %s571_s18 }
 0x14e   : > { %v416_v8 = vadd.f32 %v415_v7, %v389_v6 }
 0x150   : > { %417 = vst.msk [vmem:[%s277_s12] sm:$0x1] %vm283_vm10, %v416_v8 }
 0x151 PF: > { %s20_s17 = sadd.s32 1, %s755_s17   ;;  %s979_s12 = smov %s739_s13 }
 0x152   : > { %p17_p9 = scmp.ge.s32.totalorder %s20_s17, 4   ;;  %s980_s13 = smov %s743_s14 }
 0x153   : > { %s981_s14 = smov %s832_s24  ;;  %s982_s15 = smov %s751_s16 }
 0x154   : > { %s983_s16 = smov %s985_s19  ;;  %19 = sbr.rel (!%p17_p9) target bundleno = 6 (0x6), region = 97 }
 0x15b   :  { %453 = vsyncpa [#allocation3], 1 }
 0x15c   :  { %455 = vsyncpa [#allocation3 + $0x1], 1 }
 0x15d   :  { %456 = vsyncpa [#allocation5], 1 }
 0x15e   :  { %458 = vsyncpa [#allocation5 + $0x1], 1 }

</bundles_post_ra>
